<compile_context>
chip_gen: v7x
topology: tpu7x:2x2x1
jax: 0.10.0
libtpu: 0.0.40
codegen_flags: <defaults>
</compile_context>

<pallas_src>
import numpy as np
import jax
import jax.numpy as jnp
from jax.experimental import pallas as pl
from jax.experimental.pallas import tpu as pltpu


def _make_kernel(B, T, N, epsilon):
    """Kernel closure. B, T, N(=B*T) are static; M, D come from the refs."""

    def kernel(x_ref, emb_ref, esq_ref, o_ref):
        x_raw = x_ref[...]                               # (2N, D) native dtype
        x = x_raw.astype(jnp.float32)
        e_sq = esq_ref[...]                              # (1, M) f32

        # One distance matmul for both modalities; contract the last dims of
        # (2N, D) and (M, D) directly (NT form) -> no transpose anywhere.
        cross = jax.lax.dot_general(
            x_raw, emb_ref[...],
            dimension_numbers=(((1,), (1,)), ((), ())),
            preferred_element_type=jnp.float32)          # (2N, M)
        x_sq = jnp.sum(x * x, axis=-1, keepdims=True)    # (2N, 1)
        d = jnp.maximum(x_sq + e_sq - 2.0 * cross, 0.0)  # clamp fp negatives
        s = jnp.sqrt(d)

        # Shared exponential for the two temperatures:
        #   softmax(-s)  = ez / sum(ez)      , ez = exp(min(s) - s) <= 1
        #   softmax(-2s) = ez^2 / sum(ez^2)
        m = jnp.min(s, axis=-1, keepdims=True)           # (2N, 1)
        ez = jnp.exp(m - s)
        ph = ez * (1.0 / jnp.sum(ez, axis=-1, keepdims=True))
        ez2 = ez * ez
        adj = ez2 * (1.0 / jnp.sum(ez2, axis=-1, keepdims=True))
        logp = jnp.log(ph + 1e-10)

        # Split the fused tile back into modalities (rows 0:N audio, N:2N
        # video). N and T are multiples of 8 -> sublane-aligned static slices.
        a_adj, v_adj = adj[:N], adj[N:]
        log_a, log_v = logp[:N], logp[N:]

        def lcmcm(adj_x, logp_y):
            # S[i][j] : (T, 1) with S[i][j][t] == Scode[t, i, j]
            # (flat rows are ordered b*T + t)
            S = [[jnp.sum(adj_x[i * T:(i + 1) * T, :] *
                          logp_y[j * T:(j + 1) * T, :],
                          axis=-1, keepdims=True)
                  for j in range(B)] for i in range(B)]

            # MaxScode = max(-Scode) over the whole (T, B, B) tensor.
            smin = jnp.min(S[0][0], keepdims=True)       # (1, 1)
            for i in range(B):
                for j in range(B):
                    if i or j:
                        smin = jnp.minimum(smin, jnp.min(S[i][j], keepdims=True))
            max_scode = -smin                            # (1, 1)

            total = jnp.zeros((1, 1), jnp.float32)
            for i in range(B):
                rowsum = jnp.zeros((T, 1), jnp.float32)
                for j in range(B):
                    rowsum = rowsum + jnp.exp(S[i][j] + max_scode)
                # -log(diag/(rowsum+eps)) == log(rowsum+eps) - (S_ii + Max)
                total = total + jnp.sum(
                    jnp.log(rowsum + epsilon) - (S[i][i] + max_scode),
                    keepdims=True)
            return total / (B * T)                       # (1, 1)

        loss = 0.5 * (lcmcm(a_adj, log_v) + lcmcm(v_adj, log_a))   # (1, 1)
        o_ref[0, 0] = loss[0, 0]                         # scalar store to SMEM

    return kernel


def cross_pclema_cmcm_loss(audio_semantic, video_semantic, embedding,
                           epsilon=1e-5):
    """Pallas implementation of Cross_PCLEMA.forward's return value (cmcm_loss).

    audio_semantic, video_semantic : (B, T, D)
    embedding (codebook)           : (M, D)
    """
    B, T, D = audio_semantic.shape
    M, D2 = embedding.shape
    assert D == D2, "embedding_dim mismatch"
    N = B * T
    assert T % 8 == 0 and N % 8 == 0, (
        "sublane-aligned slicing needs T and B*T to be multiples of 8")

    # Fused (2N, D) input: rows [0:N] audio, [N:2N] video. Native dtype is
    # DMA'd; the cast to f32 happens inside the kernel.
    x = jnp.concatenate([audio_semantic.reshape(N, D),
                         video_semantic.reshape(N, D)], axis=0)

    # Codebook squared norms precomputed outside (tiny (1, M) input); codebook
    # itself keeps its native (M, D) layout.
    emb_f32 = embedding.astype(jnp.float32)
    e_sq = jnp.sum(emb_f32 * emb_f32, axis=1).reshape(1, M)

    kernel = _make_kernel(B, T, N, epsilon)

    out = pl.pallas_call(
        kernel,
        out_shape=jax.ShapeDtypeStruct((1, 1), jnp.float32),
        in_specs=[
            pl.BlockSpec(memory_space=pltpu.MemorySpace.VMEM),   # x (2N, D)
            pl.BlockSpec(memory_space=pltpu.MemorySpace.VMEM),   # codebook (M, D)
            pl.BlockSpec(memory_space=pltpu.MemorySpace.VMEM),   # e_sq (1, M)
        ],
        out_specs=pl.BlockSpec(memory_space=pltpu.MemorySpace.SMEM),
    )(x, embedding, e_sq)

    # TODO(synk): the EMA codebook updates (ema_count / ema_weight / embedding
    # in-place mutation), the torch.mode equal_num diagnostic, and the
    # dead-code re-init of unactivated entries (Python random.randint +
    # data-dependent loops over .item()) are module-state / host-RNG side
    # effects with no clean Pallas equivalent; only the returned cmcm_loss is
    # computed here.
    return out[0, 0]


def reference_cmcm_loss(audio, video, embedding, epsilon=1e-5):
    """Pure-JAX reference mirroring the PyTorch forward's loss computation."""
    B, T, D = audio.shape
    M = embedding.shape[0]
    emb = embedding.astype(jnp.float32)
    a_flat = audio.reshape(-1, D).astype(jnp.float32)
    v_flat = video.reshape(-1, D).astype(jnp.float32)

    def dist(x):
        return (jnp.sum(emb ** 2, axis=1)[None, :]
                + jnp.sum(x ** 2, axis=1, keepdims=True)
                - 2.0 * jnp.dot(x, emb.T))

    def d2ph(d, t):
        return jax.nn.softmax(-jnp.sqrt(d) / t, axis=-1)

    a_d, v_d = dist(a_flat), dist(v_flat)
    a_ph = d2ph(a_d, 1.0).reshape(B, T, M)
    v_ph = d2ph(v_d, 1.0).reshape(B, T, M)
    a_adj = d2ph(a_d, 0.5).reshape(B, T, M)
    v_adj = d2ph(v_d, 0.5).reshape(B, T, M)

    a_pH = jnp.transpose(a_ph, (1, 0, 2))                 # (T, B, M)
    v_pH = jnp.transpose(v_ph, (1, 0, 2))

    def lcmcm(adj_btm, ph_tbm):
        adj_tbm = jnp.transpose(adj_btm, (1, 0, 2))       # (T, B, M)
        S = jnp.einsum('tim,tjm->tij', adj_tbm, jnp.log(ph_tbm + 1e-10))
        max_s = jnp.max(-S)
        ES = jnp.exp(S + max_s)
        ES_sum = jnp.sum(ES, axis=-1)                     # (T, B)
        diag = jnp.diagonal(ES, axis1=-2, axis2=-1)       # (T, B)
        return jnp.mean(-jnp.log(diag / (ES_sum + epsilon)))

    return 0.5 * (lcmcm(a_adj, v_pH) + lcmcm(v_adj, a_pH))


if __name__ == "__main__":
    # Shapes consistent with the module: batch=2, seq=8, embedding_dim=32,
    # n_embeddings=128 (lane-friendly codebook size).
    B, T, D = 2, 8, 32
    M = 128

    key = jax.random.PRNGKey(0)
    ka, kv, ke = jax.random.split(key, 3)
    audio = jax.random.normal(ka, (B, T, D), dtype=jnp.float32)
    video = jax.random.normal(kv, (B, T, D), dtype=jnp.float32)
    # Codebook state; module inits uniform(+-1/400) — use a slightly spread
    # codebook so the softmaxes are non-degenerate for the numerical check.
    embedding = 0.1 * jax.random.normal(ke, (M, D), dtype=jnp.float32)

    loss = jax.block_until_ready(
        cross_pclema_cmcm_loss(audio, video, embedding))
    loss_ref = jax.block_until_ready(
        reference_cmcm_loss(audio, video, embedding))

    np.testing.assert_allclose(np.asarray(loss), np.asarray(loss_ref),
                               rtol=1e-4, atol=1e-4)
    print("KERNEL_OK")
</pallas_src>

<mosaic_0001>
module attributes {stable_mosaic.version = 11 : i64} {
  func.func @kernel(%arg0: memref<32x32xf32, #tpu.memory_space<vmem>>, %arg1: memref<128x32xf32, #tpu.memory_space<vmem>>, %arg2: memref<1x128xf32, #tpu.memory_space<vmem>>, %arg3: memref<1x1xf32, #tpu.memory_space<smem>>) attributes {dimension_semantics = [], scalar_prefetch = 0 : i64, scratch_operands = 0 : i64, tpu.core_type = #tpu.core_type<tc>} {
    %c0 = arith.constant 0 : index
    %c0_0 = arith.constant 0 : index
    %0 = vector.load %arg0[%c0, %c0_0] : memref<32x32xf32, #tpu.memory_space<vmem>>, vector<32x32xf32>
    %c0_1 = arith.constant 0 : index
    %c0_2 = arith.constant 0 : index
    %1 = vector.load %arg2[%c0_1, %c0_2] : memref<1x128xf32, #tpu.memory_space<vmem>>, vector<1x128xf32>
    %c0_3 = arith.constant 0 : index
    %c0_4 = arith.constant 0 : index
    %2 = vector.load %arg1[%c0_3, %c0_4] : memref<128x32xf32, #tpu.memory_space<vmem>>, vector<128x32xf32>
    %cst = arith.constant dense<0.000000e+00> : vector<32x128xf32>
    %3 = tpu.matmul %0, %2, %cst {dimension_numbers = #tpu.dot_dimension_numbers<[1], [1], [0], [0], [0, 0, 1, 0], [], []>} : vector<32x32xf32>, vector<128x32xf32>, vector<32x128xf32> -> vector<32x128xf32>
    %4 = arith.mulf %0, %0 : vector<32x32xf32>
    %cst_5 = arith.constant dense<0.000000e+00> : vector<32xf32>
    %5 = vector.multi_reduction <add>, %4, %cst_5 [1] : vector<32x32xf32> to vector<32xf32>
    %6 = vector.shape_cast %5 : vector<32xf32> to vector<32x1xf32>
    %7 = vector.broadcast %6 : vector<32x1xf32> to vector<32x128xf32>
    %8 = vector.broadcast %1 : vector<1x128xf32> to vector<32x128xf32>
    %9 = arith.addf %7, %8 : vector<32x128xf32>
    %cst_6 = arith.constant 2.000000e+00 : f32
    %10 = vector.broadcast %cst_6 : f32 to vector<32x128xf32>
    %11 = arith.mulf %10, %3 : vector<32x128xf32>
    %12 = arith.subf %9, %11 : vector<32x128xf32>
    %cst_7 = arith.constant 0.000000e+00 : f32
    %13 = vector.broadcast %cst_7 : f32 to vector<32x128xf32>
    %14 = arith.maximumf %12, %13 : vector<32x128xf32>
    %15 = math.sqrt %14 : vector<32x128xf32>
    %cst_8 = arith.constant dense<0x7F800000> : vector<32xf32>
    %16 = vector.multi_reduction <minimumf>, %15, %cst_8 [1] : vector<32x128xf32> to vector<32xf32>
    %17 = vector.shape_cast %16 : vector<32xf32> to vector<32x1xf32>
    %18 = vector.broadcast %17 : vector<32x1xf32> to vector<32x128xf32>
    %19 = arith.subf %18, %15 : vector<32x128xf32>
    %20 = math.exp %19 : vector<32x128xf32>
    %cst_9 = arith.constant dense<0.000000e+00> : vector<32xf32>
    %21 = vector.multi_reduction <add>, %20, %cst_9 [1] : vector<32x128xf32> to vector<32xf32>
    %22 = vector.shape_cast %21 : vector<32xf32> to vector<32x1xf32>
    %cst_10 = arith.constant 1.000000e+00 : f32
    %23 = vector.broadcast %cst_10 : f32 to vector<32x1xf32>
    %24 = arith.divf %23, %22 : vector<32x1xf32>
    %25 = vector.broadcast %24 : vector<32x1xf32> to vector<32x128xf32>
    %26 = arith.mulf %20, %25 : vector<32x128xf32>
    %27 = arith.mulf %20, %20 : vector<32x128xf32>
    %cst_11 = arith.constant dense<0.000000e+00> : vector<32xf32>
    %28 = vector.multi_reduction <add>, %27, %cst_11 [1] : vector<32x128xf32> to vector<32xf32>
    %29 = vector.shape_cast %28 : vector<32xf32> to vector<32x1xf32>
    %cst_12 = arith.constant 1.000000e+00 : f32
    %30 = vector.broadcast %cst_12 : f32 to vector<32x1xf32>
    %31 = arith.divf %30, %29 : vector<32x1xf32>
    %32 = vector.broadcast %31 : vector<32x1xf32> to vector<32x128xf32>
    %33 = arith.mulf %27, %32 : vector<32x128xf32>
    %cst_13 = arith.constant 1.000000e-10 : f32
    %34 = vector.broadcast %cst_13 : f32 to vector<32x128xf32>
    %35 = arith.addf %26, %34 : vector<32x128xf32>
    %36 = math.log %35 : vector<32x128xf32>
    %37 = vector.extract_strided_slice %33 {offsets = [0, 0], sizes = [16, 128], strides = [1, 1]} : vector<32x128xf32> to vector<16x128xf32>
    %38 = vector.extract_strided_slice %33 {offsets = [16, 0], sizes = [16, 128], strides = [1, 1]} : vector<32x128xf32> to vector<16x128xf32>
    %39 = vector.extract_strided_slice %36 {offsets = [0, 0], sizes = [16, 128], strides = [1, 1]} : vector<32x128xf32> to vector<16x128xf32>
    %40 = vector.extract_strided_slice %36 {offsets = [16, 0], sizes = [16, 128], strides = [1, 1]} : vector<32x128xf32> to vector<16x128xf32>
    %41 = vector.extract_strided_slice %37 {offsets = [0, 0], sizes = [8, 128], strides = [1, 1]} : vector<16x128xf32> to vector<8x128xf32>
    %42 = vector.extract_strided_slice %40 {offsets = [0, 0], sizes = [8, 128], strides = [1, 1]} : vector<16x128xf32> to vector<8x128xf32>
    %43 = arith.mulf %41, %42 : vector<8x128xf32>
    %cst_14 = arith.constant dense<0.000000e+00> : vector<8xf32>
    %44 = vector.multi_reduction <add>, %43, %cst_14 [1] : vector<8x128xf32> to vector<8xf32>
    %45 = vector.shape_cast %44 : vector<8xf32> to vector<8x1xf32>
    %46 = vector.extract_strided_slice %37 {offsets = [0, 0], sizes = [8, 128], strides = [1, 1]} : vector<16x128xf32> to vector<8x128xf32>
    %47 = vector.extract_strided_slice %40 {offsets = [8, 0], sizes = [8, 128], strides = [1, 1]} : vector<16x128xf32> to vector<8x128xf32>
    %48 = arith.mulf %46, %47 : vector<8x128xf32>
    %cst_15 = arith.constant dense<0.000000e+00> : vector<8xf32>
    %49 = vector.multi_reduction <add>, %48, %cst_15 [1] : vector<8x128xf32> to vector<8xf32>
    %50 = vector.shape_cast %49 : vector<8xf32> to vector<8x1xf32>
    %51 = vector.extract_strided_slice %37 {offsets = [8, 0], sizes = [8, 128], strides = [1, 1]} : vector<16x128xf32> to vector<8x128xf32>
    %52 = vector.extract_strided_slice %40 {offsets = [0, 0], sizes = [8, 128], strides = [1, 1]} : vector<16x128xf32> to vector<8x128xf32>
    %53 = arith.mulf %51, %52 : vector<8x128xf32>
    %cst_16 = arith.constant dense<0.000000e+00> : vector<8xf32>
    %54 = vector.multi_reduction <add>, %53, %cst_16 [1] : vector<8x128xf32> to vector<8xf32>
    %55 = vector.shape_cast %54 : vector<8xf32> to vector<8x1xf32>
    %56 = vector.extract_strided_slice %37 {offsets = [8, 0], sizes = [8, 128], strides = [1, 1]} : vector<16x128xf32> to vector<8x128xf32>
    %57 = vector.extract_strided_slice %40 {offsets = [8, 0], sizes = [8, 128], strides = [1, 1]} : vector<16x128xf32> to vector<8x128xf32>
    %58 = arith.mulf %56, %57 : vector<8x128xf32>
    %cst_17 = arith.constant dense<0.000000e+00> : vector<8xf32>
    %59 = vector.multi_reduction <add>, %58, %cst_17 [1] : vector<8x128xf32> to vector<8xf32>
    %60 = vector.shape_cast %59 : vector<8xf32> to vector<8x1xf32>
    %61 = vector.shape_cast %45 : vector<8x1xf32> to vector<1x8x1xf32>
    %cst_18 = arith.constant dense<0x7F800000> : vector<1xf32>
    %62 = vector.multi_reduction <minimumf>, %61, %cst_18 [1, 2] : vector<1x8x1xf32> to vector<1xf32>
    %63 = vector.shape_cast %62 : vector<1xf32> to vector<1x1x1xf32>
    %64 = vector.extract %63[0, 0, 0] : f32 from vector<1x1x1xf32>
    %65 = vector.broadcast %64 : f32 to vector<1x1xf32>
    %66 = vector.shape_cast %50 : vector<8x1xf32> to vector<1x8x1xf32>
    %cst_19 = arith.constant dense<0x7F800000> : vector<1xf32>
    %67 = vector.multi_reduction <minimumf>, %66, %cst_19 [1, 2] : vector<1x8x1xf32> to vector<1xf32>
    %68 = vector.shape_cast %67 : vector<1xf32> to vector<1x1x1xf32>
    %69 = vector.extract %68[0, 0, 0] : f32 from vector<1x1x1xf32>
    %70 = vector.broadcast %69 : f32 to vector<1x1xf32>
    %71 = arith.minimumf %65, %70 : vector<1x1xf32>
    %72 = vector.shape_cast %55 : vector<8x1xf32> to vector<1x8x1xf32>
    %cst_20 = arith.constant dense<0x7F800000> : vector<1xf32>
    %73 = vector.multi_reduction <minimumf>, %72, %cst_20 [1, 2] : vector<1x8x1xf32> to vector<1xf32>
    %74 = vector.shape_cast %73 : vector<1xf32> to vector<1x1x1xf32>
    %75 = vector.extract %74[0, 0, 0] : f32 from vector<1x1x1xf32>
    %76 = vector.broadcast %75 : f32 to vector<1x1xf32>
    %77 = arith.minimumf %71, %76 : vector<1x1xf32>
    %78 = vector.shape_cast %60 : vector<8x1xf32> to vector<1x8x1xf32>
    %cst_21 = arith.constant dense<0x7F800000> : vector<1xf32>
    %79 = vector.multi_reduction <minimumf>, %78, %cst_21 [1, 2] : vector<1x8x1xf32> to vector<1xf32>
    %80 = vector.shape_cast %79 : vector<1xf32> to vector<1x1x1xf32>
    %81 = vector.extract %80[0, 0, 0] : f32 from vector<1x1x1xf32>
    %82 = vector.broadcast %81 : f32 to vector<1x1xf32>
    %83 = arith.minimumf %77, %82 : vector<1x1xf32>
    %cst_22 = arith.constant 0.000000e+00 : f32
    %84 = vector.broadcast %cst_22 : f32 to vector<1x1xf32>
    %85 = arith.subf %84, %83 : vector<1x1xf32>
    %cst_23 = arith.constant 0.000000e+00 : f32
    %86 = vector.broadcast %cst_23 : f32 to vector<1x1xf32>
    %cst_24 = arith.constant 0.000000e+00 : f32
    %87 = vector.broadcast %cst_24 : f32 to vector<8x1xf32>
    %88 = vector.broadcast %85 : vector<1x1xf32> to vector<8x1xf32>
    %89 = arith.addf %45, %88 : vector<8x1xf32>
    %90 = math.exp %89 : vector<8x1xf32>
    %91 = arith.addf %87, %90 : vector<8x1xf32>
    %92 = vector.broadcast %85 : vector<1x1xf32> to vector<8x1xf32>
    %93 = arith.addf %50, %92 : vector<8x1xf32>
    %94 = math.exp %93 : vector<8x1xf32>
    %95 = arith.addf %91, %94 : vector<8x1xf32>
    %cst_25 = arith.constant 9.99999974E-6 : f32
    %96 = vector.broadcast %cst_25 : f32 to vector<8x1xf32>
    %97 = arith.addf %95, %96 : vector<8x1xf32>
    %98 = math.log %97 : vector<8x1xf32>
    %99 = vector.broadcast %85 : vector<1x1xf32> to vector<8x1xf32>
    %100 = arith.addf %45, %99 : vector<8x1xf32>
    %101 = arith.subf %98, %100 : vector<8x1xf32>
    %102 = vector.shape_cast %101 : vector<8x1xf32> to vector<1x8x1xf32>
    %cst_26 = arith.constant dense<0.000000e+00> : vector<1xf32>
    %103 = vector.multi_reduction <add>, %102, %cst_26 [1, 2] : vector<1x8x1xf32> to vector<1xf32>
    %104 = vector.shape_cast %103 : vector<1xf32> to vector<1x1x1xf32>
    %105 = vector.extract %104[0, 0, 0] : f32 from vector<1x1x1xf32>
    %106 = vector.broadcast %105 : f32 to vector<1x1xf32>
    %107 = arith.addf %86, %106 : vector<1x1xf32>
    %cst_27 = arith.constant 0.000000e+00 : f32
    %108 = vector.broadcast %cst_27 : f32 to vector<8x1xf32>
    %109 = vector.broadcast %85 : vector<1x1xf32> to vector<8x1xf32>
    %110 = arith.addf %55, %109 : vector<8x1xf32>
    %111 = math.exp %110 : vector<8x1xf32>
    %112 = arith.addf %108, %111 : vector<8x1xf32>
    %113 = vector.broadcast %85 : vector<1x1xf32> to vector<8x1xf32>
    %114 = arith.addf %60, %113 : vector<8x1xf32>
    %115 = math.exp %114 : vector<8x1xf32>
    %116 = arith.addf %112, %115 : vector<8x1xf32>
    %cst_28 = arith.constant 9.99999974E-6 : f32
    %117 = vector.broadcast %cst_28 : f32 to vector<8x1xf32>
    %118 = arith.addf %116, %117 : vector<8x1xf32>
    %119 = math.log %118 : vector<8x1xf32>
    %120 = vector.broadcast %85 : vector<1x1xf32> to vector<8x1xf32>
    %121 = arith.addf %60, %120 : vector<8x1xf32>
    %122 = arith.subf %119, %121 : vector<8x1xf32>
    %123 = vector.shape_cast %122 : vector<8x1xf32> to vector<1x8x1xf32>
    %cst_29 = arith.constant dense<0.000000e+00> : vector<1xf32>
    %124 = vector.multi_reduction <add>, %123, %cst_29 [1, 2] : vector<1x8x1xf32> to vector<1xf32>
    %125 = vector.shape_cast %124 : vector<1xf32> to vector<1x1x1xf32>
    %126 = vector.extract %125[0, 0, 0] : f32 from vector<1x1x1xf32>
    %127 = vector.broadcast %126 : f32 to vector<1x1xf32>
    %128 = arith.addf %107, %127 : vector<1x1xf32>
    %cst_30 = arith.constant 1.600000e+01 : f32
    %129 = vector.broadcast %cst_30 : f32 to vector<1x1xf32>
    %130 = arith.divf %128, %129 : vector<1x1xf32>
    %131 = vector.extract_strided_slice %38 {offsets = [0, 0], sizes = [8, 128], strides = [1, 1]} : vector<16x128xf32> to vector<8x128xf32>
    %132 = vector.extract_strided_slice %39 {offsets = [0, 0], sizes = [8, 128], strides = [1, 1]} : vector<16x128xf32> to vector<8x128xf32>
    %133 = arith.mulf %131, %132 : vector<8x128xf32>
    %cst_31 = arith.constant dense<0.000000e+00> : vector<8xf32>
    %134 = vector.multi_reduction <add>, %133, %cst_31 [1] : vector<8x128xf32> to vector<8xf32>
    %135 = vector.shape_cast %134 : vector<8xf32> to vector<8x1xf32>
    %136 = vector.extract_strided_slice %38 {offsets = [0, 0], sizes = [8, 128], strides = [1, 1]} : vector<16x128xf32> to vector<8x128xf32>
    %137 = vector.extract_strided_slice %39 {offsets = [8, 0], sizes = [8, 128], strides = [1, 1]} : vector<16x128xf32> to vector<8x128xf32>
    %138 = arith.mulf %136, %137 : vector<8x128xf32>
    %cst_32 = arith.constant dense<0.000000e+00> : vector<8xf32>
    %139 = vector.multi_reduction <add>, %138, %cst_32 [1] : vector<8x128xf32> to vector<8xf32>
    %140 = vector.shape_cast %139 : vector<8xf32> to vector<8x1xf32>
    %141 = vector.extract_strided_slice %38 {offsets = [8, 0], sizes = [8, 128], strides = [1, 1]} : vector<16x128xf32> to vector<8x128xf32>
    %142 = vector.extract_strided_slice %39 {offsets = [0, 0], sizes = [8, 128], strides = [1, 1]} : vector<16x128xf32> to vector<8x128xf32>
    %143 = arith.mulf %141, %142 : vector<8x128xf32>
    %cst_33 = arith.constant dense<0.000000e+00> : vector<8xf32>
    %144 = vector.multi_reduction <add>, %143, %cst_33 [1] : vector<8x128xf32> to vector<8xf32>
    %145 = vector.shape_cast %144 : vector<8xf32> to vector<8x1xf32>
    %146 = vector.extract_strided_slice %38 {offsets = [8, 0], sizes = [8, 128], strides = [1, 1]} : vector<16x128xf32> to vector<8x128xf32>
    %147 = vector.extract_strided_slice %39 {offsets = [8, 0], sizes = [8, 128], strides = [1, 1]} : vector<16x128xf32> to vector<8x128xf32>
    %148 = arith.mulf %146, %147 : vector<8x128xf32>
    %cst_34 = arith.constant dense<0.000000e+00> : vector<8xf32>
    %149 = vector.multi_reduction <add>, %148, %cst_34 [1] : vector<8x128xf32> to vector<8xf32>
    %150 = vector.shape_cast %149 : vector<8xf32> to vector<8x1xf32>
    %151 = vector.shape_cast %135 : vector<8x1xf32> to vector<1x8x1xf32>
    %cst_35 = arith.constant dense<0x7F800000> : vector<1xf32>
    %152 = vector.multi_reduction <minimumf>, %151, %cst_35 [1, 2] : vector<1x8x1xf32> to vector<1xf32>
    %153 = vector.shape_cast %152 : vector<1xf32> to vector<1x1x1xf32>
    %154 = vector.extract %153[0, 0, 0] : f32 from vector<1x1x1xf32>
    %155 = vector.broadcast %154 : f32 to vector<1x1xf32>
    %156 = vector.shape_cast %140 : vector<8x1xf32> to vector<1x8x1xf32>
    %cst_36 = arith.constant dense<0x7F800000> : vector<1xf32>
    %157 = vector.multi_reduction <minimumf>, %156, %cst_36 [1, 2] : vector<1x8x1xf32> to vector<1xf32>
    %158 = vector.shape_cast %157 : vector<1xf32> to vector<1x1x1xf32>
    %159 = vector.extract %158[0, 0, 0] : f32 from vector<1x1x1xf32>
    %160 = vector.broadcast %159 : f32 to vector<1x1xf32>
    %161 = arith.minimumf %155, %160 : vector<1x1xf32>
    %162 = vector.shape_cast %145 : vector<8x1xf32> to vector<1x8x1xf32>
    %cst_37 = arith.constant dense<0x7F800000> : vector<1xf32>
    %163 = vector.multi_reduction <minimumf>, %162, %cst_37 [1, 2] : vector<1x8x1xf32> to vector<1xf32>
    %164 = vector.shape_cast %163 : vector<1xf32> to vector<1x1x1xf32>
    %165 = vector.extract %164[0, 0, 0] : f32 from vector<1x1x1xf32>
    %166 = vector.broadcast %165 : f32 to vector<1x1xf32>
    %167 = arith.minimumf %161, %166 : vector<1x1xf32>
    %168 = vector.shape_cast %150 : vector<8x1xf32> to vector<1x8x1xf32>
    %cst_38 = arith.constant dense<0x7F800000> : vector<1xf32>
    %169 = vector.multi_reduction <minimumf>, %168, %cst_38 [1, 2] : vector<1x8x1xf32> to vector<1xf32>
    %170 = vector.shape_cast %169 : vector<1xf32> to vector<1x1x1xf32>
    %171 = vector.extract %170[0, 0, 0] : f32 from vector<1x1x1xf32>
    %172 = vector.broadcast %171 : f32 to vector<1x1xf32>
    %173 = arith.minimumf %167, %172 : vector<1x1xf32>
    %cst_39 = arith.constant 0.000000e+00 : f32
    %174 = vector.broadcast %cst_39 : f32 to vector<1x1xf32>
    %175 = arith.subf %174, %173 : vector<1x1xf32>
    %cst_40 = arith.constant 0.000000e+00 : f32
    %176 = vector.broadcast %cst_40 : f32 to vector<1x1xf32>
    %cst_41 = arith.constant 0.000000e+00 : f32
    %177 = vector.broadcast %cst_41 : f32 to vector<8x1xf32>
    %178 = vector.broadcast %175 : vector<1x1xf32> to vector<8x1xf32>
    %179 = arith.addf %135, %178 : vector<8x1xf32>
    %180 = math.exp %179 : vector<8x1xf32>
    %181 = arith.addf %177, %180 : vector<8x1xf32>
    %182 = vector.broadcast %175 : vector<1x1xf32> to vector<8x1xf32>
    %183 = arith.addf %140, %182 : vector<8x1xf32>
    %184 = math.exp %183 : vector<8x1xf32>
    %185 = arith.addf %181, %184 : vector<8x1xf32>
    %cst_42 = arith.constant 9.99999974E-6 : f32
    %186 = vector.broadcast %cst_42 : f32 to vector<8x1xf32>
    %187 = arith.addf %185, %186 : vector<8x1xf32>
    %188 = math.log %187 : vector<8x1xf32>
    %189 = vector.broadcast %175 : vector<1x1xf32> to vector<8x1xf32>
    %190 = arith.addf %135, %189 : vector<8x1xf32>
    %191 = arith.subf %188, %190 : vector<8x1xf32>
    %192 = vector.shape_cast %191 : vector<8x1xf32> to vector<1x8x1xf32>
    %cst_43 = arith.constant dense<0.000000e+00> : vector<1xf32>
    %193 = vector.multi_reduction <add>, %192, %cst_43 [1, 2] : vector<1x8x1xf32> to vector<1xf32>
    %194 = vector.shape_cast %193 : vector<1xf32> to vector<1x1x1xf32>
    %195 = vector.extract %194[0, 0, 0] : f32 from vector<1x1x1xf32>
    %196 = vector.broadcast %195 : f32 to vector<1x1xf32>
    %197 = arith.addf %176, %196 : vector<1x1xf32>
    %cst_44 = arith.constant 0.000000e+00 : f32
    %198 = vector.broadcast %cst_44 : f32 to vector<8x1xf32>
    %199 = vector.broadcast %175 : vector<1x1xf32> to vector<8x1xf32>
    %200 = arith.addf %145, %199 : vector<8x1xf32>
    %201 = math.exp %200 : vector<8x1xf32>
    %202 = arith.addf %198, %201 : vector<8x1xf32>
    %203 = vector.broadcast %175 : vector<1x1xf32> to vector<8x1xf32>
    %204 = arith.addf %150, %203 : vector<8x1xf32>
    %205 = math.exp %204 : vector<8x1xf32>
    %206 = arith.addf %202, %205 : vector<8x1xf32>
    %cst_45 = arith.constant 9.99999974E-6 : f32
    %207 = vector.broadcast %cst_45 : f32 to vector<8x1xf32>
    %208 = arith.addf %206, %207 : vector<8x1xf32>
    %209 = math.log %208 : vector<8x1xf32>
    %210 = vector.broadcast %175 : vector<1x1xf32> to vector<8x1xf32>
    %211 = arith.addf %150, %210 : vector<8x1xf32>
    %212 = arith.subf %209, %211 : vector<8x1xf32>
    %213 = vector.shape_cast %212 : vector<8x1xf32> to vector<1x8x1xf32>
    %cst_46 = arith.constant dense<0.000000e+00> : vector<1xf32>
    %214 = vector.multi_reduction <add>, %213, %cst_46 [1, 2] : vector<1x8x1xf32> to vector<1xf32>
    %215 = vector.shape_cast %214 : vector<1xf32> to vector<1x1x1xf32>
    %216 = vector.extract %215[0, 0, 0] : f32 from vector<1x1x1xf32>
    %217 = vector.broadcast %216 : f32 to vector<1x1xf32>
    %218 = arith.addf %197, %217 : vector<1x1xf32>
    %cst_47 = arith.constant 1.600000e+01 : f32
    %219 = vector.broadcast %cst_47 : f32 to vector<1x1xf32>
    %220 = arith.divf %218, %219 : vector<1x1xf32>
    %221 = arith.addf %130, %220 : vector<1x1xf32>
    %cst_48 = arith.constant 5.000000e-01 : f32
    %222 = vector.broadcast %cst_48 : f32 to vector<1x1xf32>
    %223 = arith.mulf %222, %221 : vector<1x1xf32>
    %224 = vector.extract %223[0, 0] : f32 from vector<1x1xf32>
    %c0_49 = arith.constant 0 : index
    %c0_50 = arith.constant 0 : index
    %225 = memref.load %arg3[%c0_49, %c0_50] : memref<1x1xf32, #tpu.memory_space<smem>>
    memref.store %224, %arg3[%c0_49, %c0_50] : memref<1x1xf32, #tpu.memory_space<smem>>
    return
  }
}

</mosaic_0001>

<bundles_post_ra>
// kernel: tpu_custom_call.1
= control target key start
LH: loop header
LB: loop body
LE: loop exit
PB: predicated region body
PF: predicated region fallthrough
CT: control target
= control target key end

     0   :  { %vm36_vm0 = vcmask 261120   ;;  %s1006_s0 = inlined_call_operand.vmem [shape: f32[32,32], index: 0, kind: input, shape index: {}]   ;;  %s1007_s1 = inlined_call_operand.vmem [shape: f32[128,32], index: 1, kind: input, shape index: {}]   ;;  %s1008_s2 = inlined_call_operand.vmem [shape: f32[1,128], index: 2, kind: input, shape index: {}]   ;;  %s1009_s3 = inlined_call_operand.hbm [shape: f32[1,1], index: 3, kind: output, shape index: {}]  }
   0x1   :  { %v20_v0 = vld [vmem:[%s1007_s1] sm:$0xff]  ;;  %v21_v1 = vld [vmem:[%s1007_s1 + $0x8] sm:$0xff]  ;;  %v22_v2 = vld [vmem:[%s1007_s1 + $0x10] sm:$0xff] }
   0x2   :  { %v617_v3 = vpack.c.bf16 %v21_v1, %v20_v0  ;;  %vm816_vm1 = vmpackc.low %vm36_vm0, %vm36_vm0  ;;  %v23_v5 = vld [vmem:[%s1007_s1 + $0x18] sm:$0xff]  ;;  %v24_v7 = vld [vmem:[%s1007_s1 + $0x20] sm:$0xff] }
   0x3   :  { %v623_v6 = vpack.c.bf16 %v23_v5, %v22_v2  ;;  %v25_v8 = vld [vmem:[%s1007_s1 + $0x28] sm:$0xff]  ;;  %v15_v9 = vld [vmem:[%s1006_s0] sm:$0xff]  ;;  %v17_v11 = vld [vmem:[%s1006_s0 + $0x10] sm:$0xff] }
   0x4   :  { %619 = vmatprep.subr.msk.bf16.mxu0 %vm816_vm1, %v617_v3  ;;  %665 = vmatprep.subr.msk.bf16.mxu1 %vm816_vm1, %v617_v3  ;;  %v182_v10 = vmul.f32 %v15_v9, %v15_v9  ;;  %v16_v12 = vld [vmem:[%s1006_s0 + $0x8] sm:$0xff]  ;;  %v18_v13 = vld [vmem:[%s1006_s0 + $0x18] sm:$0xff]  ;;  %v184_v14 = vmul.f32 %v17_v11, %v17_v11 }
   0x5   :  { %622 = vmatpush3.bf16.xpose.msk.msra.mxu0 %vm816_vm1, %v617_v3  ;;  %673 = vmatpush3.bf16.xpose.msk.msra.mxu1 %vm816_vm1, %v617_v3  ;;  %v185_v15 = vmul.f32 %v18_v13, %v18_v13  ;;  %v183_v16 = vmul.f32 %v16_v12, %v16_v12 }
   0x6   :  { %625 = vmatprep.subr.msk.bf16.mxu0 %vm816_vm1, %v623_v6  ;;  %666 = vmatprep.subr.msk.bf16.mxu1 %vm816_vm1, %v623_v6 }
   0x7   :  { %611 = vmatprep.mubr.msk.f32.mxu0 %vm36_vm0, %v15_v9  ;;  %614 = vmatprep.mubr.msk.f32.mxu1 %vm36_vm0, %v17_v11 }
   0x8   :  { %8 = vsyncpa [#allocation3], 0  ;;  %v186_v17 = vsel %vm36_vm0, %v182_v10, 0.0  ;;  %v629_v18 = vpack.c.bf16 %v25_v8, %v24_v7  ;;  %v192_v19 = vsel %vm36_vm0, %v184_v14, 0.0  ;;  %v195_v20 = vsel %vm36_vm0, %v185_v15, 0.0  ;;  %v26_v22 = vld [vmem:[%s1007_s1 + $0x30] sm:$0xff] }
   0x9   :  { %187 = vadd.xlane.f32.xlu1 %v186_v17  ;;  %193 = vadd.xlane.f32.xlu0 %v192_v19  ;;  %v189_v21 = vsel %vm36_vm0, %v183_v16, 0.0  ;;  %v27_v23 = vld [vmem:[%s1007_s1 + $0x38] sm:$0xff]  ;;  %v28_v25 = vld [vmem:[%s1007_s1 + $0x40] sm:$0xff]  ;;  %v29_v26 = vld [vmem:[%s1007_s1 + $0x48] sm:$0xff]  ;;  %vm384_vm10 = vcmask 7168   ;;  %s772_s11 = scalar_lea.hbm %s1009_s3, 16 }
   0xa   :  { %v635_v24 = vpack.c.bf16 %v27_v23, %v26_v22  ;;  %v641_v27 = vpack.c.bf16 %v29_v26, %v28_v25  ;;  %v30_v28 = vld [vmem:[%s1007_s1 + $0x50] sm:$0xff]  ;;  %v31_v29 = vld [vmem:[%s1007_s1 + $0x58] sm:$0xff]  ;;  %v32_v31 = vld [vmem:[%s1007_s1 + $0x60] sm:$0xff]  ;;  %p773_p0 = scmp.ne.s32.totalorder %s1009_s3, %s772_s11  ;;  %p776_p1 = scmp.lt.u32.totalorder %s772_s11, %s1009_s3 }
   0xb   :  { %v647_v30 = vpack.c.bf16 %v31_v29, %v30_v28  ;;  %v33_v32 = vld [vmem:[%s1007_s1 + $0x68] sm:$0xff]  ;;  %v34_v34 = vld [vmem:[%s1007_s1 + $0x70] sm:$0xff]  ;;  %v35_v35 = vld [vmem:[%s1007_s1 + $0x78] sm:$0xff] }
   0xc   :  { %v653_v33 = vpack.c.bf16 %v33_v32, %v32_v31  ;;  %v659_v36 = vpack.c.bf16 %v35_v35, %v34_v34  ;;  %v558_v39 = vld [vmem:[%s1008_s2] ss:$0 sm:$0xff]  ;;  %p778_p2 = pnand %p776_p1, %p773_p0 }
   0xd   :  { %628 = vmatpush3.bf16.xpose.msk.msra.mxu0 %vm816_vm1, %v623_v6  ;;  %674 = vmatpush3.bf16.xpose.msk.msra.mxu1 %vm816_vm1, %v623_v6 }
   0xe   :  { %631 = vmatprep.subr.msk.bf16.mxu0 %vm816_vm1, %v629_v18  ;;  %667 = vmatprep.subr.msk.bf16.mxu1 %vm816_vm1, %v629_v18 }
   0xf   :  { %196 = vadd.xlane.f32.xlu0 %v195_v20  ;;  %190 = vadd.xlane.f32.xlu1 %v189_v21 }
  0x15   :  { %634 = vmatpush3.bf16.xpose.msk.msra.mxu0 %vm816_vm1, %v629_v18  ;;  %675 = vmatpush3.bf16.xpose.msk.msra.mxu1 %vm816_vm1, %v629_v18 }
  0x16   :  { %637 = vmatprep.subr.msk.bf16.mxu0 %vm816_vm1, %v635_v24  ;;  %668 = vmatprep.subr.msk.bf16.mxu1 %vm816_vm1, %v635_v24 }
  0x1d   :  { %640 = vmatpush3.bf16.xpose.msk.msra.mxu0 %vm816_vm1, %v635_v24  ;;  %676 = vmatpush3.bf16.xpose.msk.msra.mxu1 %vm816_vm1, %v635_v24 }
  0x1e   :  { %643 = vmatprep.subr.msk.bf16.mxu0 %vm816_vm1, %v641_v27  ;;  %669 = vmatprep.subr.msk.bf16.mxu1 %vm816_vm1, %v641_v27 }
  0x25   :  { %646 = vmatpush3.bf16.xpose.msk.msra.mxu0 %vm816_vm1, %v641_v27  ;;  %677 = vmatpush3.bf16.xpose.msk.msra.mxu1 %vm816_vm1, %v641_v27 }
  0x26   :  { %649 = vmatprep.subr.msk.bf16.mxu0 %vm816_vm1, %v647_v30  ;;  %670 = vmatprep.subr.msk.bf16.mxu1 %vm816_vm1, %v647_v30 }
  0x2d   :  { %652 = vmatpush3.bf16.xpose.msk.msra.mxu0 %vm816_vm1, %v647_v30  ;;  %678 = vmatpush3.bf16.xpose.msk.msra.mxu1 %vm816_vm1, %v647_v30 }
  0x2e   :  { %655 = vmatprep.subr.msk.bf16.mxu0 %vm816_vm1, %v653_v33  ;;  %671 = vmatprep.subr.msk.bf16.mxu1 %vm816_vm1, %v653_v33 }
  0x35   :  { %658 = vmatpush3.bf16.xpose.msk.msra.mxu0 %vm816_vm1, %v653_v33  ;;  %679 = vmatpush3.bf16.xpose.msk.msra.mxu1 %vm816_vm1, %v653_v33 }
  0x36   :  { %661 = vmatprep.subr.msk.bf16.mxu0 %vm816_vm1, %v659_v36  ;;  %672 = vmatprep.subr.msk.bf16.mxu1 %vm816_vm1, %v659_v36 }
  0x3d   :  { %664 = vmatpush3.bf16.xpose.msk.msra.mxu0 %vm816_vm1, %v659_v36  ;;  %680 = vmatpush3.bf16.xpose.msk.msra.mxu1 %vm816_vm1, %v659_v36 }
  0x44   :  { %612 = vmatmul.mubr.msk.f32.vlgmr.msra.gmra.mrb[0].mxu0 %vm36_vm0, %v16_v12  ;;  %615 = vmatmul.mubr.msk.f32.vlgmr.msra.gmra.mrb[0].mxu1 %vm36_vm0, %v18_v13 }
  0x96   :  { %v194_v37 = vpop.xlane.xlu0 %193  ;;  %v188_v38 = vpop.xlane.xlu1 %187 }
  0x97   :  { %v204_v44 = vadd.f32 %v558_v39, %v188_v38  ;;  %v206_v51 = vadd.f32 %v558_v39, %v194_v37 }
  0x9c   :  { %v197_v40 = vpop.xlane.xlu0 %196  ;;  %v191_v41 = vpop.xlane.xlu1 %190 }
  0x9d   :  { %v207_v42 = vadd.f32 %v558_v39, %v197_v40  ;;  %v205_v43 = vadd.f32 %v558_v39, %v191_v41 }
 0x117   :  { %v616_v45 = vpop.f32.mrb[0].mxu1  ;;  %v613_v46 = vpop.f32.mrb[0].mxu0 }
 0x118   :  { %v211_v47 = vmul.f32 2.0, %v616_v45  ;;  %v209_v48 = vmul.f32 2.0, %v613_v46  ;;  %v163_v49 = vpop.f32.mrb[1].mxu0  ;;  %v173_v50 = vpop.f32.mrb[1].mxu1 }
 0x119   :  { %v208_v52 = vmul.f32 2.0, %v163_v49  ;;  %v210_v53 = vmul.f32 2.0, %v173_v50 }
 0x11a   :  { %v215_v54 = vsub.f32 %v207_v42, %v211_v47  ;;  %v213_v55 = vsub.f32 %v205_v43, %v209_v48 }
 0x11b   :  { %v212_v56 = vsub.f32 %v204_v44, %v208_v52  ;;  %v214_v57 = vsub.f32 %v206_v51, %v210_v53 }
 0x11c   :  { %v219_v58 = vmax.f32 %v215_v54, 0.0  ;;  %v217_v59 = vmax.f32 %v213_v55, 0.0 }
 0x11d   :  { %v216_v60 = vmax.f32 %v212_v56, 0.0  ;;  %v218_v61 = vmax.f32 %v214_v57, 0.0 }
 0x11e   :  { %708 = vrsqrt.f32 %v219_v58  ;;  %vm243_vm2 = vcmp.eq.f32.partialorder %v219_v58, inf  ;;  %vm245_vm3 = vcmp.eq.f32.partialorder %v219_v58, 0.0  ;;  %v246_v1 = vand.u32 2147483648, %v219_v58 }
 0x11f   :  { %710 = vrsqrt.f32 %v218_v61  ;;  %vm236_vm4 = vcmp.eq.f32.partialorder %v218_v61, inf  ;;  %vm238_vm5 = vcmp.eq.f32.partialorder %v218_v61, 0.0  ;;  %vm229_vm6 = vcmp.eq.f32.partialorder %v217_v59, inf }
 0x120   :  { %712 = vrsqrt.f32 %v217_v59  ;;  %v239_v6 = vand.u32 2147483648, %v218_v61  ;;  %vm222_vm7 = vcmp.eq.f32.partialorder %v216_v60, inf  ;;  %v232_v10 = vand.u32 2147483648, %v217_v59 }
 0x121   :  { %714 = vrsqrt.f32 %v216_v60  ;;  %vm231_vm8 = vcmp.eq.f32.partialorder %v217_v59, 0.0  ;;  %v225_v14 = vand.u32 2147483648, %v216_v60  ;;  %vm224_vm9 = vcmp.eq.f32.partialorder %v216_v60, 0.0 }
 0x128   :  { %v709_v62 = vpop.eup %708 }
 0x129   :  { %v711_v63 = vpop.eup %710  ;;  %v242_v0 = vmul.f32 %v709_v62, %v219_v58 }
 0x12a   :  { %v713_v2 = vpop.eup %712  ;;  %v235_v3 = vmul.f32 %v711_v63, %v218_v61 }
 0x12b   :  { %v715_v4 = vpop.eup %714  ;;  %v244_v5 = vsel %vm243_vm2, %v219_v58, %v242_v0  ;;  %v228_v7 = vmul.f32 %v713_v2, %v217_v59 }
 0x12c   :  { %v247_v8 = vsel %vm245_vm3, %v246_v1, %v244_v5  ;;  %v237_v9 = vsel %vm236_vm4, %v218_v61, %v235_v3  ;;  %v221_v11 = vmul.f32 %v715_v4, %v216_v60 }
 0x12d   :  { %254 = vmin.xlane.f32.xlu1 %v247_v8  ;;  %v240_v12 = vsel %vm238_vm5, %v239_v6, %v237_v9  ;;  %v230_v13 = vsel %vm229_vm6, %v217_v59, %v228_v7 }
 0x12e   :  { %252 = vmin.xlane.f32.xlu0 %v240_v12  ;;  %v223_v15 = vsel %vm222_vm7, %v216_v60, %v221_v11  ;;  %v233_v16 = vsel %vm231_vm8, %v232_v10, %v230_v13 }
 0x12f   :  { %v226_v17 = vsel %vm224_vm9, %v225_v14, %v223_v15 }
 0x131   :  { %250 = vmin.xlane.f32.xlu1 %v233_v16 }
 0x132   :  { %248 = vmin.xlane.f32.xlu0 %v226_v17 }
 0x1ba   :  { %v255_v18 = vpop.xlane.xlu1 %254 }
 0x1bb   :  { %v259_v19 = vsub.f32 %v255_v18, %v247_v8  ;;  %v253_v20 = vpop.xlane.xlu0 %252 }
 0x1bc   :  { %v258_v21 = vsub.f32 %v253_v20, %v240_v12 }
 0x1bd   :  { %v266_v22 = vmul.f32 1.442695, %v259_v19 }
 0x1be   :  { %v264_v23 = vmul.f32 1.442695, %v258_v21  ;;  %v251_v24 = vpop.xlane.xlu1 %250 }
 0x1bf   :  { %716 = vpow2.f32 %v266_v22  ;;  %v257_v25 = vsub.f32 %v251_v24, %v233_v16  ;;  %v249_v26 = vpop.xlane.xlu0 %248 }
 0x1c0   :  { %718 = vpow2.f32 %v264_v23  ;;  %v256_v27 = vsub.f32 %v249_v26, %v226_v17 }
 0x1c1   :  { %v262_v28 = vmul.f32 1.442695, %v257_v25 }
 0x1c2   :  { %v260_v29 = vmul.f32 1.442695, %v256_v27 }
 0x1c3   :  { %720 = vpow2.f32 %v262_v28 }
 0x1c4   :  { %722 = vpow2.f32 %v260_v29 }
 0x1c9   :  { %v717_v30 = vpop.eup %716 }
 0x1ca   :  { %v719_v31 = vpop.eup %718  ;;  %274 = vadd.xlane.f32.xlu1 %v717_v30  ;;  %v956_v58 = vmul.f32 %v717_v30, %v717_v30 }
 0x1cb   :  { %272 = vadd.xlane.f32.xlu0 %v719_v31  ;;  %v290_v59 = vmul.f32 %v719_v31, %v719_v31 }
 0x1cd   :  { %v946_v32 = vpop.eup %720 }
 0x1ce   :  { %v948_v33 = vpop.eup %722  ;;  %v289_v34 = vmul.f32 %v946_v32, %v946_v32 }
 0x1cf   :  { %v288_v35 = vmul.f32 %v948_v33, %v948_v33 }
 0x1d0   :  { %294 = vadd.xlane.f32.xlu1 %v289_v34 }
 0x1d1   :  { %292 = vadd.xlane.f32.xlu0 %v288_v35 }
 0x257   :  { %v275_v36 = vpop.xlane.xlu1 %274 }
 0x258   :  { %724 = vrcp.f32 %v275_v36  ;;  %v273_v37 = vpop.xlane.xlu0 %272 }
 0x259   :  { %726 = vrcp.f32 %v273_v37 }
 0x25d   :  { %v295_v44 = vpop.xlane.xlu1 %294 }
 0x25e   :  { %v293_v39 = vpop.xlane.xlu0 %292 }
 0x25f   :  { %728 = vrcp.f32 %v293_v39 }
 0x262   :  { %v725_v38 = vpop.eup %724 }
 0x263   :  { %v727_v40 = vpop.eup %726  ;;  %v287_v41 = vmul.f32 %v725_v38, %v717_v30 }
 0x264   :  { %v286_v42 = vmul.f32 %v727_v40, %v719_v31 }
 0x265   :  { %v315_v43 = vadd.f32 1e-10, %v287_v41 }
 0x266   :  { %v314_v45 = vadd.f32 1e-10, %v286_v42 }
 0x267   :  { %730 = vlog2.f32 %v315_v43 }
 0x268   :  { %732 = vlog2.f32 %v314_v45 }
 0x269   :  { %734 = vrcp.f32 %v295_v44  ;;  %v729_v46 = vpop.eup %728 }
 0x26a   :  { %v308_v49 = vmul.f32 %v729_v46, %v288_v35 }
 0x271   :  { %v731_v47 = vpop.eup %730 }
 0x272   :  { %v733_v48 = vpop.eup %732  ;;  %v323_v50 = vmul.f32 0.6931472, %v731_v47 }
 0x273   :  { %v735_v51 = vpop.eup %734  ;;  %v321_v52 = vmul.f32 0.6931472, %v733_v48 }
 0x274   :  { %v327_v53 = vmul.f32 %v323_v50, %v308_v49  ;;  %v309_v55 = vmul.f32 %v735_v51, %v289_v34 }
 0x275   :  { %v324_v54 = vmul.f32 %v321_v52, %v308_v49 }
 0x276   :  { %328 = vadd.xlane.f32.xlu1 %v327_v53  ;;  %v333_v56 = vmul.f32 %v323_v50, %v309_v55  ;;  %v330_v57 = vmul.f32 %v321_v52, %v309_v55 }
 0x277   :  { %325 = vadd.xlane.f32.xlu0 %v324_v54 }
 0x27a   :  { %334 = vadd.xlane.f32.xlu1 %v333_v56 }
 0x27b   :  { %331 = vadd.xlane.f32.xlu0 %v330_v57 }
 0x27e   :  { %270 = vadd.xlane.f32.xlu1 %v946_v32 }
 0x27f   :  { %268 = vadd.xlane.f32.xlu0 %v948_v33 }
 0x282   :  { %298 = vadd.xlane.f32.xlu1 %v956_v58 }
 0x283   :  { %296 = vadd.xlane.f32.xlu0 %v290_v59 }
 0x303   :  { %v959_v60 = vpop.xlane.xlu1 %328 }
 0x304   :  { %v344_v61 = vrot.slane %v959_v60, 4  ;;  %v962_v62 = vpop.xlane.xlu0 %325 }
 0x305   :  { %v336_v63 = vrot.slane %v962_v62, 4 }
 0x306   :  { %v345_v0 = vmin.f32 %v959_v60, %v344_v61 }
 0x307   :  { %v337_v1 = vmin.f32 %v962_v62, %v336_v63  ;;  %v967_v2 = vpop.xlane.xlu1 %334 }
 0x308   :  { %v362_v3 = vrot.slane %v967_v2, 4  ;;  %v332_v4 = vpop.xlane.xlu0 %331  ;;  %v346_v5 = vrot.slane %v345_v0, 2 }
 0x309   :  { %v353_v6 = vrot.slane %v332_v4, 4  ;;  %v338_v7 = vrot.slane %v337_v1, 2 }
 0x30a   :  { %v363_v8 = vmin.f32 %v967_v2, %v362_v3  ;;  %v347_v9 = vmin.f32 %v345_v0, %v346_v5 }
 0x30b   :  { %v354_v10 = vmin.f32 %v332_v4, %v353_v6  ;;  %v271_v11 = vpop.xlane.xlu1 %270  ;;  %v339_v12 = vmin.f32 %v337_v1, %v338_v7 }
 0x30c   :  { %736 = vrcp.f32 %v271_v11  ;;  %v269_v13 = vpop.xlane.xlu0 %268  ;;  %v348_v14 = vrot.slane %v347_v9, 1  ;;  %v364_v15 = vrot.slane %v363_v8, 2 }
 0x30d   :  { %738 = vrcp.f32 %v269_v13  ;;  %v340_v16 = vrot.slane %v339_v12, 1  ;;  %v355_v17 = vrot.slane %v354_v10, 2 }
 0x30e   :  { %v349_v18 = vmin.f32 %v347_v9, %v348_v14  ;;  %v365_v19 = vmin.f32 %v363_v8, %v364_v15 }
 0x30f   :  { %v341_v20 = vmin.f32 %v339_v12, %v340_v16  ;;  %v356_v21 = vmin.f32 %v354_v10, %v355_v17 }
 0x310   :  { %v366_v22 = vrot.slane %v365_v19, 1  ;;  %v297_v27 = vpop.xlane.xlu0 %296 }
 0x311   :  { %681 = vpush %v341_v20  ;;  %v357_v23 = vrot.slane %v356_v21, 1  ;;  %740 = vrcp.f32 %v297_v27 }
 0x312   :  { %683 = vpush %v349_v18  ;;  %v367_v24 = vmin.f32 %v365_v19, %v366_v22 }
 0x313   :  { %v358_v25 = vmin.f32 %v356_v21, %v357_v23 }
 0x315   :  { %685 = vpush %v358_v25 }
 0x316   :  { %v737_v26 = vpop.eup %736  ;;  %687 = vpush %v367_v24 }
 0x317   :  { %v739_v28 = vpop.eup %738  ;;  %v285_v29 = vmul.f32 %v737_v26, %v946_v32 }
 0x318   :  { %v284_v30 = vmul.f32 %v739_v28, %v948_v33 }
 0x319   :  { %v313_v31 = vadd.f32 1e-10, %v285_v29 }
 0x31a   :  { %v312_v34 = vadd.f32 1e-10, %v284_v30 }
 0x31b   :  { %742 = vlog2.f32 %v313_v31  ;;  %v741_v35 = vpop.eup %740 }
 0x31c   :  { %744 = vlog2.f32 %v312_v34  ;;  %v310_v38 = vmul.f32 %v741_v35, %v290_v59 }
 0x325   :  { %v743_v36 = vpop.eup %742 }
 0x326   :  { %v745_v37 = vpop.eup %744  ;;  %v319_v39 = vmul.f32 0.6931472, %v743_v36 }
 0x327   :  { %v317_v40 = vmul.f32 0.6931472, %v745_v37 }
 0x328   :  { %v426_v41 = vmul.f32 %v319_v39, %v310_v38 }
 0x329   :  { %v423_v42 = vmul.f32 %v317_v40, %v310_v38 }
 0x32a   :  { %427 = vadd.xlane.f32.xlu1 %v426_v41 }
 0x32b   :  { %424 = vadd.xlane.f32.xlu0 %v423_v42 }
 0x342   :  { %s682_s2 = spop %681 }
 0x343   :  { %v343_v43 = vstv %s682_s2  ;;  %s684_s25 = spop %683 }
 0x344   :  { %v351_v32 = vstv %s684_s25 }
 0x345   :  { %v352_v33 = vmin.f32 %v343_v43, %v351_v32 }
 0x346   :  { %s686_s26 = spop %685 }
 0x347   :  { %v360_v44 = vstv %s686_s26  ;;  %s688_s27 = spop %687 }
 0x348   :  { %v361_v45 = vmin.f32 %v352_v33, %v360_v44  ;;  %v369_v46 = vstv %s688_s27 }
 0x34a   :  { %v370_v47 = vmin.f32 %v361_v45, %v369_v46 }
 0x34c   :  { %v371_v48 = vsub.f32 0.0, %v370_v47 }
 0x34e   :  { %v376_v49 = vadd.f32 %v371_v48, %v959_v60  ;;  %v397_v50 = vadd.f32 %v371_v48, %v332_v4  ;;  %v401_v51 = vadd.f32 %v371_v48, %v967_v2  ;;  %v372_v52 = vadd.f32 %v371_v48, %v962_v62  ;;  %v299_v4 = vpop.xlane.xlu1 %298 }
 0x350   :  { %v377_v53 = vmul.f32 1.442695, %v376_v49  ;;  %v398_v54 = vmul.f32 1.442695, %v397_v50  ;;  %v402_v55 = vmul.f32 1.442695, %v401_v51 }
 0x351   :  { %v373_v56 = vmul.f32 1.442695, %v372_v52 }
 0x352   :  { %746 = vpow2.f32 %v377_v53 }
 0x353   :  { %748 = vpow2.f32 %v398_v54 }
 0x354   :  { %750 = vpow2.f32 %v402_v55 }
 0x355   :  { %752 = vpow2.f32 %v373_v56 }
 0x35c   :  { %v747_v57 = vpop.eup %746 }
 0x35d   :  { %v749_v59 = vpop.eup %748 }
 0x35e   :  { %v751_v61 = vpop.eup %750 }
 0x35f   :  { %v753_v63 = vpop.eup %752  ;;  %v404_v0 = vadd.f32 %v751_v61, %v749_v59 }
 0x360   :  { %v379_v1 = vadd.f32 %v753_v63, %v747_v57 }
 0x361   :  { %v405_v60 = vadd.f32 1e-05, %v404_v0 }
 0x362   :  { %v380_v3 = vadd.f32 1e-05, %v379_v1 }
 0x363   :  { %754 = vlog2.f32 %v405_v60 }
 0x364   :  { %756 = vlog2.f32 %v380_v3 }
 0x365   :  { %758 = vrcp.f32 %v299_v4 }
 0x36d   :  { %v755_v62 = vpop.eup %754 }
 0x36e   :  { %v757_v2 = vpop.eup %756  ;;  %v407_v5 = vmul.f32 0.6931472, %v755_v62 }
 0x36f   :  { %v382_v6 = vmul.f32 0.6931472, %v757_v2  ;;  %v759_v7 = vpop.eup %758 }
 0x370   :  { %v408_v8 = vsub.f32 %v407_v5, %v401_v51  ;;  %v311_v12 = vmul.f32 %v759_v7, %v956_v58 }
 0x371   :  { %v383_v9 = vsub.f32 %v382_v6, %v372_v52 }
 0x372   :  { %v409_v10 = vsel %vm384_vm10, %v408_v8, 0.0  ;;  %v432_v13 = vmul.f32 %v319_v39, %v311_v12  ;;  %v429_v14 = vmul.f32 %v317_v40, %v311_v12 }
 0x373   :  { %410 = vadd.xlane.f32.xlu1 %v409_v10  ;;  %v385_v11 = vsel %vm384_vm10, %v383_v9, 0.0 }
 0x374   :  { %386 = vadd.xlane.f32.xlu0 %v385_v11 }
 0x377   :  { %433 = vadd.xlane.f32.xlu1 %v432_v13 }
 0x378   :  { %430 = vadd.xlane.f32.xlu0 %v429_v14 }
 0x3b7   :  { %v981_v16 = vpop.xlane.xlu1 %427 }
 0x3b8   :  { %v979_v15 = vpop.xlane.xlu0 %424  ;;  %v443_v18 = vrot.slane %v981_v16, 4 }
 0x3b9   :  { %v435_v17 = vrot.slane %v979_v15, 4 }
 0x3ba   :  { %v444_v20 = vmin.f32 %v981_v16, %v443_v18 }
 0x3bb   :  { %v436_v19 = vmin.f32 %v979_v15, %v435_v17 }
 0x3bc   :  { %v445_v26 = vrot.slane %v444_v20, 2 }
 0x3bd   :  { %v437_v24 = vrot.slane %v436_v19, 2 }
 0x3be   :  { %v446_v39 = vmin.f32 %v444_v20, %v445_v26 }
 0x3bf   :  { %v438_v36 = vmin.f32 %v436_v19, %v437_v24 }
 0x3c0   :  { %v447_v46 = vrot.slane %v446_v39, 1 }
 0x3c1   :  { %v439_v33 = vrot.slane %v438_v36, 1 }
 0x3c2   :  { %v448_v53 = vmin.f32 %v446_v39, %v447_v46 }
 0x3c3   :  { %v440_v51 = vmin.f32 %v438_v36, %v439_v33 }
 0x400   :  { %v411_v21 = vpop.xlane.xlu1 %410 }
 0x401   :  { %v412_v22 = vrot.slane %v411_v21, 4  ;;  %v387_v58 = vpop.xlane.xlu0 %386 }
 0x402   :  { %v388_v23 = vrot.slane %v387_v58, 4 }
 0x403   :  { %v413_v25 = vadd.f32 %v412_v22, %v411_v21 }
 0x404   :  { %v389_v27 = vadd.f32 %v388_v23, %v387_v58  ;;  %v434_v28 = vpop.xlane.xlu1 %433 }
 0x405   :  { %v414_v29 = vrot.slane %v413_v25, 2  ;;  %v461_v30 = vrot.slane %v434_v28, 4  ;;  %v431_v31 = vpop.xlane.xlu0 %430 }
 0x406   :  { %v390_v34 = vrot.slane %v389_v27, 2  ;;  %v452_v35 = vrot.slane %v431_v31, 4 }
 0x407   :  { %v462_v37 = vmin.f32 %v434_v28, %v461_v30  ;;  %v415_v38 = vadd.f32 %v414_v29, %v413_v25 }
 0x408   :  { %v453_v40 = vmin.f32 %v431_v31, %v452_v35  ;;  %v391_v41 = vadd.f32 %v390_v34, %v389_v27 }
 0x409   :  { %v416_v42 = vrot.slane %v415_v38, 1  ;;  %v463_v43 = vrot.slane %v462_v37, 2 }
 0x40a   :  { %v392_v32 = vrot.slane %v391_v41, 1  ;;  %v454_v44 = vrot.slane %v453_v40, 2 }
 0x40b   :  { %v417_v45 = vadd.f32 %v416_v42, %v415_v38  ;;  %v464_v47 = vmin.f32 %v462_v37, %v463_v43 }
 0x40c   :  { %v393_v48 = vadd.f32 %v392_v32, %v391_v41  ;;  %v455_v49 = vmin.f32 %v453_v40, %v454_v44 }
 0x40d   :  { %v465_v50 = vrot.slane %v464_v47, 1 }
 0x40e   :  { %689 = vpush %v393_v48  ;;  %v456_v52 = vrot.slane %v455_v49, 1 }
 0x40f   :  { %691 = vpush %v417_v45  ;;  %v466_v54 = vmin.f32 %v464_v47, %v465_v50 }
 0x410   :  { %693 = vpush %v440_v51  ;;  %v457_v55 = vmin.f32 %v455_v49, %v456_v52 }
 0x411   :  { %695 = vpush %v448_v53 }
 0x412   :  { %697 = vpush %v457_v55 }
 0x413   :  { %699 = vpush %v466_v54 }
 0x43f   :  { %s690_s28 = spop %689 }
 0x440   :  { %v395_v56 = vstv %s690_s28  ;;  %s692_s29 = spop %691 }
 0x441   :  { %v419_v57 = vstv %s692_s29  ;;  %s694_s30 = spop %693 }
 0x442   :  { %v987_v59 = vadd.f32 %v419_v57, %v395_v56  ;;  %v442_v61 = vstv %s694_s30  ;;  %s696_s4 = spop %695 }
 0x443   :  { %v450_v63 = vstv %s696_s4  ;;  %s698_s0 = spop %697 }
 0x444   :  { %v451_v0 = vmin.f32 %v442_v61, %v450_v63  ;;  %v459_v1 = vstv %s698_s0  ;;  %s700_s5 = spop %699  ;;  %v422_v44 = vmul.f32 0.0625, %v987_v59 }
 0x445   :  { %v468_v3 = vstv %s700_s5 }
 0x446   :  { %v460_v60 = vmin.f32 %v451_v0, %v459_v1 }
 0x448   :  { %v469_v4 = vmin.f32 %v460_v60, %v468_v3 }
 0x44a   :  { %v470_v62 = vsub.f32 0.0, %v469_v4 }
 0x44c   :  { %v475_v2 = vadd.f32 %v470_v62, %v981_v16  ;;  %v495_v5 = vadd.f32 %v470_v62, %v431_v31  ;;  %v499_v6 = vadd.f32 %v470_v62, %v434_v28  ;;  %v471_v7 = vadd.f32 %v470_v62, %v979_v15 }
 0x44e   :  { %v476_v8 = vmul.f32 1.442695, %v475_v2  ;;  %v496_v9 = vmul.f32 1.442695, %v495_v5  ;;  %v500_v10 = vmul.f32 1.442695, %v499_v6 }
 0x44f   :  { %v472_v11 = vmul.f32 1.442695, %v471_v7 }
 0x450   :  { %760 = vpow2.f32 %v476_v8 }
 0x451   :  { %762 = vpow2.f32 %v496_v9 }
 0x452   :  { %764 = vpow2.f32 %v500_v10 }
 0x453   :  { %766 = vpow2.f32 %v472_v11 }
 0x45a   :  { %v761_v12 = vpop.eup %760 }
 0x45b   :  { %v763_v13 = vpop.eup %762 }
 0x45c   :  { %v765_v14 = vpop.eup %764 }
 0x45d   :  { %v767_v17 = vpop.eup %766  ;;  %v502_v18 = vadd.f32 %v765_v14, %v763_v13 }
 0x45e   :  { %v478_v19 = vadd.f32 %v767_v17, %v761_v12 }
 0x45f   :  { %v503_v20 = vadd.f32 1e-05, %v502_v18 }
 0x460   :  { %v479_v16 = vadd.f32 1e-05, %v478_v19 }
 0x461   :  { %768 = vlog2.f32 %v503_v20 }
 0x462   :  { %770 = vlog2.f32 %v479_v16 }
 0x46b   :  { %v769_v21 = vpop.eup %768 }
 0x46c   :  { %v771_v15 = vpop.eup %770  ;;  %v505_v22 = vmul.f32 0.6931472, %v769_v21 }
 0x46d   :  { %v481_v58 = vmul.f32 0.6931472, %v771_v15 }
 0x46e   :  { %v506_v23 = vsub.f32 %v505_v22, %v499_v6 }
 0x46f   :  { %v482_v24 = vsub.f32 %v481_v58, %v471_v7 }
 0x470   :  { %v507_v25 = vsel %vm384_vm10, %v506_v23, 0.0 }
 0x471   :  { %508 = vadd.xlane.f32.xlu1 %v507_v25  ;;  %v483_v26 = vsel %vm384_vm10, %v482_v24, 0.0 }
 0x472   :  { %484 = vadd.xlane.f32.xlu0 %v483_v26 }
 0x4fe   :  { %v509_v27 = vpop.xlane.xlu1 %508 }
 0x4ff   :  { %v510_v28 = vrot.slane %v509_v27, 4  ;;  %v485_v29 = vpop.xlane.xlu0 %484 }
 0x500   :  { %v486_v30 = vrot.slane %v485_v29, 4 }
 0x501   :  { %v511_v31 = vadd.f32 %v510_v28, %v509_v27 }
 0x502   :  { %v487_v34 = vadd.f32 %v486_v30, %v485_v29 }
 0x503   :  { %v512_v35 = vrot.slane %v511_v31, 2 }
 0x504   :  { %v488_v36 = vrot.slane %v487_v34, 2 }
 0x505   :  { %v513_v37 = vadd.f32 %v512_v35, %v511_v31 }
 0x506   :  { %v489_v38 = vadd.f32 %v488_v36, %v487_v34 }
 0x507   :  { %v514_v39 = vrot.slane %v513_v37, 1 }
 0x508   :  { %v490_v40 = vrot.slane %v489_v38, 1 }
 0x509   :  { %v515_v41 = vadd.f32 %v514_v39, %v513_v37 }
 0x50a   :  { %v491_v42 = vadd.f32 %v490_v40, %v489_v38 }
 0x50c   :  { %701 = vpush %v491_v42 }
 0x50d   :  { %703 = vpush %v515_v41 }
 0x53d   :  { %s702_s6 = spop %701 }
 0x53e   :  { %v493_v43 = vstv %s702_s6  ;;  %s704_s7 = spop %703 }
 0x53f   :  { %v517_v32 = vstv %s704_s7 }
 0x540   :  { %v518_v33 = vadd.f32 %v517_v32, %v493_v43 }
 0x542   :  { %v519_v45 = vmul.f32 0.0625, %v518_v33 }
 0x544   :  { %v520_v46 = vadd.f32 %v519_v45, %v422_v44 }
 0x546   :  { %v521_v47 = vmul.f32 0.5, %v520_v46 }
 0x548   :  { %705 = vpush %v521_v47 }
 0x579   :  { %s706_s8 = spop %705 }
 0x57a   :  { %524 = sst [smem:[#allocation2]] %s706_s8 }
 0x57b   :  { %781 = shalt.err (!%p778_p2)
}
 0x57c   :  { %s784_s16 = smov [#allocation2]  }
 0x57d   :  { %532 = dma.smem_to_hbm %s784_s16, 16, %s1009_s3, [#allocation3]  }
 0x57e   :  { %782 = dma.done.wait [#allocation3], 16  }
 0x57f   :  { %783 = vsyncadd [#allocation3], 4294967280 }
 0x580   :  { %536 = sfence }
 0x581   :  { %537 = vsyncpa [#allocation3], 1 }

</bundles_post_ra>
